<compile_context>
chip_gen: v7x
topology: tpu7x:2x2x1
jax: 0.10.0
libtpu: 0.0.40
codegen_flags: <defaults>
</compile_context>

<pallas_src>
import jax
import jax.numpy as jnp
from jax import lax
from jax.experimental import pallas as pl
from jax.experimental.pallas import tpu as pltpu


def _round_up(x, m):
    return ((x + m - 1) // m) * m


def _cdiv(a, b):
    return (a + b - 1) // b


# ---------------- Stage 1: beta network (BN folded, eval mode) ----------------
def _beta_kernel(xb_ref, w1_ref, b1_ref, w2_ref, b2_ref, beta_ref):
    h = jnp.dot(xb_ref[...], w1_ref[...], preferred_element_type=jnp.float32)
    h = jnp.maximum(h + b1_ref[...], 0.0)                     # BN+bias folded, ReLU
    beta_ref[...] = (jnp.dot(h, w2_ref[...], preferred_element_type=jnp.float32)
                     + b2_ref[...]).astype(beta_ref.dtype)


# ---------------- Stage 2: factor network, emitted pre-transposed (k, N_f) ----
def _factor_t_kernel(xf_ref, wft_ref, bft_ref, fac_t_ref):
    # fac_t[k, tn] = wf.T (k, din_f) contracted with x_f tile (tn, din_f) on din_f
    ft = lax.dot_general(wft_ref[...], xf_ref[...],
                         dimension_numbers=(((1,), (1,)), ((), ())),
                         preferred_element_type=jnp.float32)
    fac_t_ref[...] = (ft + bft_ref[...]).astype(fac_t_ref.dtype)


# ---------------- Stage 3: out = beta @ fac_t (plain NN matmul) ---------------
def _outer_kernel(beta_ref, fact_ref, out_ref):
    out_ref[...] = jnp.dot(beta_ref[...], fact_ref[...],
                           preferred_element_type=jnp.float32).astype(out_ref.dtype)


def ca1_forward(x_beta, x_factor, params, *,
                tm_max=1024, tn_max=2048,          # stage-3 output tile (rows, cols)
                tm_rows_max=4096, tn_rows_max=8192,  # stage-1/2 streaming row tiles
                out_dtype=jnp.float32):
    (w1, b1, bn_scale, bn_shift, w2, b2, wf, bf) = params
    n_beta, din_b = x_beta.shape
    n_factor, din_f = x_factor.shape
    hidden = w1.shape[1]
    k = w2.shape[1]
    assert wf.shape[1] == k, "output_dim_beta must equal output_dim_factor"

    # Fold eval-mode BatchNorm into the first linear layer (exact in eval mode).
    w1f = (w1 * bn_scale).astype(jnp.float32)
    b1f = (b1 * bn_scale + bn_shift).astype(jnp.float32)
    # Pre-transposed factor weights so stage 2 emits fac_t with shape (k, N_f).
    wft = wf.T            # (k, din_f)
    bft = bf.T            # (k, 1)

    # ----- Stage-3 output tiles: lane-dense, large (store-bound kernel) -------
    tm3 = min(tm_max, _round_up(n_beta, 8))
    tn3 = min(tn_max, _round_up(n_factor, 128))
    nb_pad3 = _round_up(n_beta, tm3)
    nf_pad3 = _round_up(n_factor, tn3)

    # ----- Decoupled, much larger row tiles for the streaming stages 1/2 ------
    # Keep the per-buffer input block <= ~8 MiB and make each row tile a
    # multiple of the corresponding stage-3 tile so stage 3 consumes a prefix.
    def _stream_tile(n_rows, row_bytes, base_tile, rows_max):
        budget_rows = max(1, (8 << 20) // max(1, row_bytes))
        blocks_needed = _cdiv(n_rows, base_tile)
        blocks = min(max(1, rows_max // base_tile),
                     max(1, budget_rows // base_tile),
                     blocks_needed)
        return max(1, blocks) * base_tile

    tm1 = _stream_tile(n_beta, din_b * 4, tm3, tm_rows_max)
    tn1 = _stream_tile(n_factor, din_f * 4, tn3, tn_rows_max)
    nb_pad1 = _round_up(n_beta, tm1)     # multiple of tm3, >= nb_pad3
    nf_pad1 = _round_up(n_factor, tn1)   # multiple of tn3, >= nf_pad3

    xb = x_beta if nb_pad1 == n_beta else jnp.pad(x_beta, ((0, nb_pad1 - n_beta), (0, 0)))
    xf = x_factor if nf_pad1 == n_factor else jnp.pad(x_factor, ((0, nf_pad1 - n_factor), (0, 0)))

    resident = lambda *_: (0, 0)   # weights/biases stay VMEM-resident across the grid

    def _vmem_limit(*block_bytes):
        # double-buffered blocks + margin for compiler temporaries
        return int(2 * sum(block_bytes) + (4 << 20))

    # Stage 1: beta = relu(x_beta @ w1' + b1') @ w2 + b2, big row tiles.
    beta = pl.pallas_call(
        _beta_kernel,
        out_shape=jax.ShapeDtypeStruct((nb_pad1, k), jnp.float32),
        grid=(nb_pad1 // tm1,),
        in_specs=[
            pl.BlockSpec((tm1, din_b), lambda i: (i, 0)),
            pl.BlockSpec((din_b, hidden), resident),
            pl.BlockSpec((1, hidden), resident),
            pl.BlockSpec((hidden, k), resident),
            pl.BlockSpec((1, k), resident),
        ],
        out_specs=pl.BlockSpec((tm1, k), lambda i: (i, 0)),
        compiler_params=pltpu.CompilerParams(
            dimension_semantics=("parallel",),
            vmem_limit_bytes=_vmem_limit(
                tm1 * din_b * 4, din_b * hidden * 4, hidden * 4,
                hidden * k * 4, k * 4, tm1 * k * 4, tm1 * hidden * 4)),
        cost_estimate=pl.CostEstimate(
            flops=2 * nb_pad1 * (din_b * hidden + hidden * k),
            transcendentals=0,
            bytes_accessed=4 * (nb_pad1 * din_b + nb_pad1 * k
                                + din_b * hidden + hidden * k + hidden + k)),
    )(xb, w1f, b1f, w2, b2)

    # Stage 2: fac_t = (wf.T @ x_factor.T) + bf.T, lane-dense (k, N_f) output.
    fac_t = pl.pallas_call(
        _factor_t_kernel,
        out_shape=jax.ShapeDtypeStruct((k, nf_pad1), jnp.float32),
        grid=(nf_pad1 // tn1,),
        in_specs=[
            pl.BlockSpec((tn1, din_f), lambda j: (j, 0)),
            pl.BlockSpec((k, din_f), resident),
            pl.BlockSpec((k, 1), resident),
        ],
        out_specs=pl.BlockSpec((k, tn1), lambda j: (0, j)),
        compiler_params=pltpu.CompilerParams(
            dimension_semantics=("parallel",),
            vmem_limit_bytes=_vmem_limit(
                tn1 * din_f * 4, k * din_f * 4, k * 4, k * tn1 * 4)),
        cost_estimate=pl.CostEstimate(
            flops=2 * nf_pad1 * din_f * k,
            transcendentals=0,
            bytes_accessed=4 * (nf_pad1 * din_f + k * nf_pad1 + din_f * k + k)),
    )(xf, wft, bft)

    # Stage 3: out = beta @ fac_t, 2-D grid of large lane-dense output tiles.
    # Put the grid axis with MORE blocks first so megacore shards evenly.
    gi = nb_pad3 // tm3
    gj = nf_pad3 // tn3
    if gi >= gj:
        grid3 = (gi, gj)
        beta_idx = lambda i, j: (i, 0)
        fact_idx = lambda i, j: (0, j)
        out_idx = lambda i, j: (i, j)
    else:
        grid3 = (gj, gi)
        beta_idx = lambda j, i: (i, 0)
        fact_idx = lambda j, i: (0, j)
        out_idx = lambda j, i: (i, j)

    out_bytes = jnp.dtype(out_dtype).itemsize
    out = pl.pallas_call(
        _outer_kernel,
        out_shape=jax.ShapeDtypeStruct((nb_pad3, nf_pad3), out_dtype),
        grid=grid3,
        in_specs=[
            pl.BlockSpec((tm3, k), beta_idx),
            pl.BlockSpec((k, tn3), fact_idx),
        ],
        out_specs=pl.BlockSpec((tm3, tn3), out_idx),
        compiler_params=pltpu.CompilerParams(
            dimension_semantics=("parallel", "parallel"),
            vmem_limit_bytes=_vmem_limit(
                tm3 * k * 4, k * tn3 * 4, tm3 * tn3 * out_bytes)),
        cost_estimate=pl.CostEstimate(
            flops=2 * nb_pad3 * nf_pad3 * k,
            transcendentals=0,
            bytes_accessed=(out_bytes * nb_pad3 * nf_pad3
                            + 4 * (nb_pad3 * k + k * nf_pad3))),
    )(beta, fac_t)

    return out[:n_beta, :n_factor]


def make_params(key, input_dim_beta, output_dim_beta,
                input_dim_factor, output_dim_factor, hidden=32):
    ks = jax.random.split(key, 10)
    u = lambda k, shape, fan_in: jax.random.uniform(
        k, shape, jnp.float32, -1.0 / jnp.sqrt(fan_in), 1.0 / jnp.sqrt(fan_in))

    # beta_network.hidden1 : Linear(input_dim_beta, 32), stored transposed [in, out]
    w1 = u(ks[0], (input_dim_beta, hidden), input_dim_beta)
    b1 = u(ks[1], (1, hidden), input_dim_beta)

    # BatchNorm1d(32) eval-mode running stats -> scale/shift
    gamma = 1.0 + 0.1 * jax.random.normal(ks[2], (1, hidden), jnp.float32)
    beta_ = 0.1 * jax.random.normal(ks[3], (1, hidden), jnp.float32)
    running_mean = 0.05 * jax.random.normal(ks[4], (1, hidden), jnp.float32)
    running_var = 1.0 + 0.1 * jax.random.uniform(ks[5], (1, hidden), jnp.float32)
    eps = 1e-5
    bn_scale = gamma / jnp.sqrt(running_var + eps)
    bn_shift = beta_ - running_mean * bn_scale

    # beta_network.linear1 : Linear(32, output_dim_beta), stored transposed
    w2 = u(ks[6], (hidden, output_dim_beta), hidden)
    b2 = u(ks[7], (1, output_dim_beta), hidden)

    # factor_network : Linear(input_dim_factor, output_dim_factor), stored transposed
    wf = u(ks[8], (input_dim_factor, output_dim_factor), input_dim_factor)
    bf = u(ks[9], (1, output_dim_factor), input_dim_factor)

    return (w1, b1, bn_scale, bn_shift, w2, b2, wf, bf)


def ca1_reference(x_beta, x_factor, params):
    (w1, b1, bn_scale, bn_shift, w2, b2, wf, bf) = params
    h = jnp.maximum((x_beta @ w1 + b1) * bn_scale + bn_shift, 0.0)
    beta = h @ w2 + b2
    fac = x_factor @ wf + bf
    return beta @ fac.T


if __name__ == "__main__":
    # Small shapes that still exercise row-padding, decoupled stage-1/2 tiles,
    # a multi-tile (3 x 2) stage-3 grid, and both grid-axis orderings.
    N_BETA, N_FACTOR = 37, 200
    INPUT_DIM_BETA, OUTPUT_DIM_BETA = 16, 8
    INPUT_DIM_FACTOR, OUTPUT_DIM_FACTOR = 8, 8   # must match output_dim_beta for @ .T

    key = jax.random.PRNGKey(0)
    k_xb, k_xf, k_p = jax.random.split(key, 3)

    x_beta = jax.random.normal(k_xb, (N_BETA, INPUT_DIM_BETA), jnp.float32)
    x_factor = jax.random.normal(k_xf, (N_FACTOR, INPUT_DIM_FACTOR), jnp.float32)

    params = make_params(k_p, INPUT_DIM_BETA, OUTPUT_DIM_BETA,
                         INPUT_DIM_FACTOR, OUTPUT_DIM_FACTOR)

    ref = ca1_reference(x_beta, x_factor, params)

    configs = [
        # forced small tiles: multi-step stage-1 grid + (3,2) stage-3 grid
        dict(tm_max=16, tn_max=128, tm_rows_max=32, tn_rows_max=128),
        # swapped-axis path: factor axis has more blocks than beta axis
        dict(tm_max=64, tn_max=128),
        # default (large-tile) path
        dict(),
    ]
    for cfg in configs:
        out = ca1_forward(x_beta, x_factor, params, **cfg)
        out = jax.block_until_ready(out)
        assert out.shape == (N_BETA, N_FACTOR)
        assert jnp.allclose(out, ref, atol=1e-3, rtol=1e-3), cfg

    print("KERNEL_OK")
</pallas_src>

<mosaic_0001>
module attributes {stable_mosaic.version = 11 : i64} {
  func.func @_beta_kernel(%arg0: i32, %arg1: memref<32x16xf32, #tpu.memory_space<vmem>>, %arg2: memref<16x32xf32, #tpu.memory_space<vmem>>, %arg3: memref<1x32xf32, #tpu.memory_space<vmem>>, %arg4: memref<32x8xf32, #tpu.memory_space<vmem>>, %arg5: memref<1x8xf32, #tpu.memory_space<vmem>>, %arg6: memref<32x8xf32, #tpu.memory_space<vmem>>) attributes {dimension_semantics = [#tpu.dimension_semantics<parallel>], iteration_bounds = array<i64: 2>, scalar_prefetch = 0 : i64, scratch_operands = 0 : i64, tpu.core_type = #tpu.core_type<tc>, window_params = [{transform_indices = @transform_0, window_bounds = array<i64: 32, 16>}, {pipeline_mode = #tpu.pipeline_mode<synchronous>, transform_indices = @transform_1, window_bounds = array<i64: 16, 32>}, {pipeline_mode = #tpu.pipeline_mode<synchronous>, transform_indices = @transform_2, window_bounds = array<i64: 1, 32>}, {pipeline_mode = #tpu.pipeline_mode<synchronous>, transform_indices = @transform_3, window_bounds = array<i64: 32, 8>}, {pipeline_mode = #tpu.pipeline_mode<synchronous>, transform_indices = @transform_4, window_bounds = array<i64: 1, 8>}, {transform_indices = @transform_5, window_bounds = array<i64: 32, 8>}]} {
    %c0 = arith.constant 0 : index
    %c0_0 = arith.constant 0 : index
    %0 = vector.load %arg1[%c0, %c0_0] : memref<32x16xf32, #tpu.memory_space<vmem>>, vector<32x16xf32>
    %c0_1 = arith.constant 0 : index
    %c0_2 = arith.constant 0 : index
    %1 = vector.load %arg2[%c0_1, %c0_2] : memref<16x32xf32, #tpu.memory_space<vmem>>, vector<16x32xf32>
    %cst = arith.constant dense<0.000000e+00> : vector<32x32xf32>
    %2 = tpu.matmul %0, %1, %cst {dimension_numbers = #tpu.dot_dimension_numbers<[1], [0], [0], [1], [0, 0, 1, 1], [], []>} : vector<32x16xf32>, vector<16x32xf32>, vector<32x32xf32> -> vector<32x32xf32>
    %c0_3 = arith.constant 0 : index
    %c0_4 = arith.constant 0 : index
    %3 = vector.load %arg3[%c0_3, %c0_4] : memref<1x32xf32, #tpu.memory_space<vmem>>, vector<1x32xf32>
    %4 = vector.broadcast %3 : vector<1x32xf32> to vector<32x32xf32>
    %5 = arith.addf %2, %4 : vector<32x32xf32>
    %cst_5 = arith.constant 0.000000e+00 : f32
    %6 = vector.broadcast %cst_5 : f32 to vector<32x32xf32>
    %7 = arith.maximumf %5, %6 : vector<32x32xf32>
    %c0_6 = arith.constant 0 : index
    %c0_7 = arith.constant 0 : index
    %8 = vector.load %arg4[%c0_6, %c0_7] : memref<32x8xf32, #tpu.memory_space<vmem>>, vector<32x8xf32>
    %cst_8 = arith.constant dense<0.000000e+00> : vector<32x8xf32>
    %9 = tpu.matmul %7, %8, %cst_8 {dimension_numbers = #tpu.dot_dimension_numbers<[1], [0], [0], [1], [0, 0, 1, 1], [], []>} : vector<32x32xf32>, vector<32x8xf32>, vector<32x8xf32> -> vector<32x8xf32>
    %c0_9 = arith.constant 0 : index
    %c0_10 = arith.constant 0 : index
    %10 = vector.load %arg5[%c0_9, %c0_10] : memref<1x8xf32, #tpu.memory_space<vmem>>, vector<1x8xf32>
    %11 = vector.broadcast %10 : vector<1x8xf32> to vector<32x8xf32>
    %12 = arith.addf %9, %11 : vector<32x8xf32>
    %c0_11 = arith.constant 0 : index
    %c0_12 = arith.constant 0 : index
    %13 = vector.load %arg6[%c0_11, %c0_12] : memref<32x8xf32, #tpu.memory_space<vmem>>, vector<32x8xf32>
    tpu.vector_store %arg6[%c0_11, %c0_12], %12 {strides = array<i32>} : memref<32x8xf32, #tpu.memory_space<vmem>>, vector<32x8xf32>,
    return
  }
  func.func @transform_0(%arg0: i32) -> (i32, i32) {
    %c0_i32 = arith.constant 0 : i32
    %c0_i32_0 = arith.constant 0 : i32
    return %arg0, %c0_i32 : i32, i32
  }
  func.func @transform_1(%arg0: i32) -> (i32, i32) {
    %c0_i32 = arith.constant 0 : i32
    %c0_i32_0 = arith.constant 0 : i32
    %c0_i32_1 = arith.constant 0 : i32
    return %c0_i32, %c0_i32_0 : i32, i32
  }
  func.func @transform_2(%arg0: i32) -> (i32, i32) {
    %c0_i32 = arith.constant 0 : i32
    %c0_i32_0 = arith.constant 0 : i32
    %c0_i32_1 = arith.constant 0 : i32
    return %c0_i32, %c0_i32_0 : i32, i32
  }
  func.func @transform_3(%arg0: i32) -> (i32, i32) {
    %c0_i32 = arith.constant 0 : i32
    %c0_i32_0 = arith.constant 0 : i32
    %c0_i32_1 = arith.constant 0 : i32
    return %c0_i32, %c0_i32_0 : i32, i32
  }
  func.func @transform_4(%arg0: i32) -> (i32, i32) {
    %c0_i32 = arith.constant 0 : i32
    %c0_i32_0 = arith.constant 0 : i32
    %c0_i32_1 = arith.constant 0 : i32
    return %c0_i32, %c0_i32_0 : i32, i32
  }
  func.func @transform_5(%arg0: i32) -> (i32, i32) {
    %c0_i32 = arith.constant 0 : i32
    %c0_i32_0 = arith.constant 0 : i32
    return %arg0, %c0_i32 : i32, i32
  }
}

</mosaic_0001>

<bundles_post_ra>
// kernel: tpu_custom_call.1
= control target key start
LH: loop header
LB: loop body
LE: loop exit
PB: predicated region body
PF: predicated region fallthrough
CT: control target
= control target key end

     0   :  { %s630_s18 = smov 0   ;;  %s678_s0 = inlined_call_operand.vmem [shape: f32[64,16], index: 0, kind: input, shape index: {}]   ;;  %s679_s1 = inlined_call_operand.vmem [shape: f32[16,32], index: 1, kind: input, shape index: {}]   ;;  %s680_s2 = inlined_call_operand.vmem [shape: f32[1,32], index: 2, kind: input, shape index: {}]   ;;  %s681_s3 = inlined_call_operand.vmem [shape: f32[32,8], index: 3, kind: input, shape index: {}]   ;;  %s682_s4 = inlined_call_operand.vmem [shape: f32[1,8], index: 4, kind: input, shape index: {}]   ;;  %s683_s5 = inlined_call_operand.vmem [shape: f32[64,8], index: 5, kind: output, shape index: {}]  }
   0x1 LB: > { %s513_s19 = sadd.s32 4294967295, %s598_s18   ;;  %p517_p0 = scmp.ge.s32.totalorder %s598_s18, 1  ;;  %s598_s18 = sphi %s630_s18, %s15_s18  }
   0x2   : > { %p188_p1 = scmp.lt.s32.totalorder %s598_s18, 3 }
   0x4   : > { %p189_p2 = pnand %p517_p0, %p188_p1 }
   0x5   : > { %v232_v0 = vld [vmem:[%s679_s1] sm:$0xff] (!%p189_p2)  ;;  %v233_v1 = vld [vmem:[%s679_s1 + $0x8] sm:$0xff] (!%p189_p2)  ;;  %s518_s24 = sshll.u32 (!%p189_p2), %s513_s19, 2  ;;  %vm241_vm0 = vcmask (!%p189_p2), 130048   ;;  %v345_v10 = vld [vmem:[%s681_s3 + $0x10] sm:$0xff] (!%p189_p2)  ;;  %vm354_vm1 = vcmask (!%p189_p2), 261120  }
   0x6   : > { %192 = sbr.rel (%p189_p2) target bundleno = 456 (0x1c8), region = 40  ;;  %v343_v2 = vld [vmem:[%s681_s3] sm:$0xff] (!%p189_p2)  ;;  %v572_v3 = vpack.c.bf16 (!%p189_p2), %v233_v1, %v232_v0  ;;  %p217_p3 = scmp.lt.s32.totalorder (!%p189_p2), %s518_s24, 7  ;;  %v344_v4 = vld [vmem:[%s681_s3 + $0x8] sm:$0xff] (!%p189_p2)  ;;  %v346_v11 = vld [vmem:[%s681_s3 + $0x18] sm:$0xff] (!%p189_p2)  ;;  %vm452_vm2 = vcmask (!%p189_p2), 64512  }
   0x7   : > { %v576_v5 = vpack.c.bf16 (!%p189_p2), %v344_v4, %v343_v2  ;;  %v580_v12 = vpack.c.bf16 (!%p189_p2), %v346_v11, %v345_v10  ;;  %v522_v13 = vld [vmem:[%s680_s2] ss:$0 sm:$0xff] (!%p189_p2) }
   0x8   : > { %573 = vmatprep.subr.bf16.mxu0 (!%p189_p2), %v572_v3  ;;  %v527_v26 = vld [vmem:[%s682_s4] ss:$0 sm:$0xff] (!%p189_p2) }
   0x9   : > { %575 = vmatpush3.bf16.msra.mxu0 (!%p189_p2), %v572_v3  ;;  %577 = vmatprep.subr.bf16.mxu1 (!%p189_p2), %v576_v5 }
   0xa   : > { %579 = vmatpush3.bf16.msra.mxu1 (!%p189_p2), %v576_v5 }
   0xb   : > { %581 = vmatprep.subr.bf16.mxu1 (!%p189_p2), %v580_v12 }
   0xd   : > { %s685_s24 = smov (!%p217_p3, %s518_s24), 7 }
   0xe   : > { %s519_s29 = sshll.u32 %s685_s24, 3  ;;  %583 = vmatpush3.bf16.msra.mxu1 %v580_v12 }
   0xf   : > { %s220_s7 = scalar_lea.vmem %s678_s0, %s519_s29  ;;  %s226_s19 = scalar_lea.vmem %s683_s5, %s519_s29 }
  0x10   : > { %v228_v6 = vld [vmem:[%s220_s7] sm:$0xff]  ;;  %v229_v7 = vld [vmem:[%s220_s7 + $0x8] sm:$0xff]  ;;  %v230_v8 = vld [vmem:[%s220_s7 + $0x10] sm:$0xff] }
  0x11   : > { %552 = vmatprep.mubr.msk.f32.mxu0 %vm241_vm0, %v228_v6  ;;  %v231_v9 = vld [vmem:[%s220_s7 + $0x18] sm:$0xff] }
  0x12   : > { %553 = vmatmul.mubr.msk.f32.vlgmr.msra.gmra.mrb[0].mxu0 %vm241_vm0, %v229_v7 }
  0x13   : > { %555 = vmatprep.mubr.msk.f32.mxu0 %vm241_vm0, %v230_v8 }
  0x16   : > { %556 = vmatmul.mubr.msk.f32.gmra.mrb[2].mxu0 %vm241_vm0, %v231_v9 }
  0xe5   : > { %v554_v14 = vpop.f32.mrb[0].mxu0 }
  0xe6   : > { %v326_v15 = vadd.f32 %v554_v14, %v522_v13  ;;  %v320_v16 = vpop.f32.mrb[1].mxu0 }
  0xe7   : > { %v321_v17 = vadd.f32 %v522_v13, %v320_v16 }
  0xe8   : > { %v340_v20 = vmax.f32 %v326_v15, 0.0 }
  0xe9   : > { %v339_v18 = vmax.f32 %v321_v17, 0.0  ;;  %v557_v19 = vpop.f32.mrb[2].mxu0 }
  0xea   : > { %v336_v21 = vadd.f32 %v557_v19, %v522_v13  ;;  %v330_v22 = vpop.f32.mrb[3].mxu0 }
  0xeb   : > { %v331_v23 = vadd.f32 %v522_v13, %v330_v22  ;;  %566 = vmatprep.mubr.msk.f32.mxu1 %vm354_vm1, %v339_v18 }
  0xec   : > { %567 = vmatmul.mubr.msk.f32.vlgmr.msra.gmra.mrb[0].mxu1 %vm354_vm1, %v340_v20  ;;  %v342_v25 = vmax.f32 %v336_v21, 0.0 }
  0xed   : > { %v341_v24 = vmax.f32 %v331_v23, 0.0 }
  0xef   : > { %569 = vmatprep.mubr.msk.f32.mxu1 %vm354_vm1, %v341_v24 }
  0xf0   : > { %570 = vmatmul.mubr.msk.f32.gmra.mrb[2].mxu1 %vm354_vm1, %v342_v25 }
 0x1bf   : > { %v568_v27 = vpop.f32.mrb[0].mxu1 }
 0x1c0   : > { %v433_v28 = vpop.f32.mrb[1].mxu1  ;;  %v439_v30 = vadd.f32 %v568_v27, %v527_v26 }
 0x1c1   : > { %v434_v29 = vadd.f32 %v527_v26, %v433_v28 }
 0x1c2   : > { %454 = vst.msk [vmem:[%s226_s19 + $0x8] sm:$0xff] %vm452_vm2, %v439_v30 }
 0x1c3   : > { %453 = vst.msk [vmem:[%s226_s19] sm:$0xff] %vm452_vm2, %v434_v29  ;;  %v571_v31 = vpop.f32.mrb[2].mxu1 }
 0x1c4   : > { %v443_v32 = vpop.f32.mrb[3].mxu1  ;;  %v449_v34 = vadd.f32 %v571_v31, %v527_v26 }
 0x1c5   : > { %v444_v33 = vadd.f32 %v527_v26, %v443_v32 }
 0x1c6   : > { %456 = vst.msk [vmem:[%s226_s19 + $0x18] sm:$0xff] %vm452_vm2, %v449_v34 }
 0x1c7   : > { %455 = vst.msk [vmem:[%s226_s19 + $0x10] sm:$0xff] %vm452_vm2, %v444_v33 }
 0x1c8 PF: > { %s15_s18 = sadd.s32 1, %s598_s18  }
 0x1c9   : > { %p12_p4 = scmp.ge.s32.totalorder %s15_s18, 4  }
 0x1cb   :  { %14 = sbr.rel (!%p12_p4) target bundleno = 1 (0x1), region = 70 }

</bundles_post_ra>
